<compile_context>
chip_gen: v7x
topology: tpu7x:2x2x1
jax: 0.10.0
libtpu: 0.0.40
codegen_flags: <defaults>
</compile_context>

<pallas_src>
import functools

import jax
import jax.numpy as jnp
import numpy as np
from jax.experimental import pallas as pl
from jax.experimental.pallas import tpu as pltpu

# ---- config (mirrors config.h / config.k / config.m of the PyTorch module) ----
N = 8          # latent width, fixed by the architecture (Linear(..., 8))
H = 2          # config.h
K = 3          # config.k
M = 6          # config.m
A_METHOD = "Learned"

# Single-pass bf16 MXU matmuls (review: HIGHEST multiplied MXU issue count 3-6x).
MXU_PRECISION = jax.lax.Precision.DEFAULT


def predictor_kernel(x_ref, w_in_ref, w_hid_ref, w_out_ref, b_ref, wpow_ref, o_ref,
                     *, seq_len, n, h, k, m, tb):
    S = seq_len
    f32 = jnp.float32

    # Bias table loaded once (avoid re-materialising small broadcasts per layer).
    b_all = b_ref[...].astype(f32)                                   # (8, 64)

    def mlp(v, s):
        # s = 0 -> encoder, s = 1 -> decoder (all indices are static Python ints).
        y = jnp.dot(v, w_in_ref[s], precision=MXU_PRECISION,
                    preferred_element_type=f32)
        y = jnp.maximum(y + b_all[4 * s + 0:4 * s + 1, :], 0.0)
        y = jnp.dot(y, w_hid_ref[2 * s + 0], precision=MXU_PRECISION,
                    preferred_element_type=f32)
        y = jnp.maximum(y + b_all[4 * s + 1:4 * s + 2, :], 0.0)
        y = jnp.dot(y, w_hid_ref[2 * s + 1], precision=MXU_PRECISION,
                    preferred_element_type=f32)
        y = jnp.maximum(y + b_all[4 * s + 2:4 * s + 3, :], 0.0)
        y = jnp.dot(y, w_out_ref[s], precision=MXU_PRECISION,
                    preferred_element_type=f32)
        return y + b_all[4 * s + 3:4 * s + 4, :n]

    # ------------- unpack the lane-dense input block (tb, S*n) -> (tb*S, n) -------------
    x2 = x_ref[...].astype(f32)                                      # (tb, S*n)
    x3 = jnp.stack([x2[:, t * n:(t + 1) * n] for t in range(S)], axis=1)  # (tb, S, n)
    xe = mlp(x3.reshape(tb * S, n), 0)                               # (tb*S, n)
    xe3 = xe.reshape(tb, S, n)

    # ------------- companion-matrix rollout -------------
    if S > m:
        r = S - m
        # acc[b, j, :] = sum_t xe[b, m-h+t+j, :] @ Wstack[t]   -> (tb, r, k*n)
        # (h small matmuls on contiguous slices instead of a lane-axis concat window)
        acc = None
        for t in range(h):
            wt = xe3[:, m - h + t: m - h + t + r, :].reshape(tb * r, n)
            part = jnp.dot(wt, wpow_ref[t], precision=MXU_PRECISION,
                           preferred_element_type=f32)               # (tb*r, k*n)
            acc = part if acc is None else acc + part
        acc = acc.reshape(tb, r, k * n)

        # Row j (global i = m+j) uses power l = min(j+1, k) -> column block min(j, k-1).
        sel = acc[:, :, (k - 1) * n: k * n]                          # steady state: A^k
        if k > 1:
            row_idx = jax.lax.broadcasted_iota(jnp.int32, (tb, r, n), 1)
            for l in range(k - 1):                                   # warm-up rows
                sel = jnp.where(row_idx == l, acc[:, :, l * n:(l + 1) * n], sel)

        pred3 = jnp.concatenate([xe3[:, :m, :], sel], axis=1)        # (tb, S, n)
    else:
        pred3 = xe3

    # ------------- decoder MLP + lane-dense output pack -------------
    out = mlp(pred3.reshape(tb * S, n), 1)                           # (tb*S, n)
    out3 = out.reshape(tb, S, n)
    out2 = jnp.concatenate([out3[:, t, :] for t in range(S)], axis=-1)  # (tb, S*n)
    o_ref[...] = out2.astype(o_ref.dtype)


@functools.partial(jax.jit, static_argnames=("h", "k", "m"))
def predictor_forward(x, w_in, w_hid, w_out, bias, w_pows, *, h, k, m):
    B, S, n = x.shape
    assert S >= m >= h >= 1, "kernel requires seq_len >= m >= h"
    sn = S * n

    # Batch tiling: target ~4K (b,s) rows per grid step (fits comfortably inside the
    # 32 MiB VMEM budget on all generations, incl. v7x's 64 MiB chips).  When TB < B
    # it is rounded to a multiple of 8 so the block sublane dim stays aligned.
    target_rows = 4096
    tb = max(1, target_rows // S)
    if tb < B:
        tb = min(B, max(8, (tb // 8) * 8))
    else:
        tb = B
    grid_b = pl.cdiv(B, tb)
    b_pad = grid_b * tb

    # Lane-dense I/O: present x / output as (B, S*n); reshape is free (contiguous).
    x2 = x.reshape(B, sn)
    if b_pad != B:
        x2 = jnp.pad(x2, ((0, b_pad - B), (0, 0)))

    def full_spec(p):
        return pl.BlockSpec(p.shape, lambda b, nd=p.ndim: (0,) * nd)

    kernel = functools.partial(predictor_kernel,
                               seq_len=S, n=n, h=h, k=k, m=m, tb=tb)

    out2 = pl.pallas_call(
        kernel,
        out_shape=jax.ShapeDtypeStruct((b_pad, sn), x.dtype),
        grid_spec=pltpu.PrefetchScalarGridSpec(
            num_scalar_prefetch=0,
            grid=(grid_b,),
            in_specs=[pl.BlockSpec((tb, sn), lambda b: (b, 0)),
                      full_spec(w_in), full_spec(w_hid), full_spec(w_out),
                      full_spec(bias), full_spec(w_pows)],
            out_specs=pl.BlockSpec((tb, sn), lambda b: (b, 0)),
        ),
        compiler_params=pltpu.CompilerParams(
            dimension_semantics=("parallel",),
            vmem_limit_bytes=32 * 1024 * 1024),
    )(x2, w_in, w_hid, w_out, bias, w_pows)

    return out2[:B].reshape(B, S, n)


# ------------------------- parameter setup (glue) -------------------------
def init_params(key):
    dims = [(N, 64), (64, 64), (64, 64), (64, N)]

    def linear(kk, fi, fo):
        kw, kb = jax.random.split(kk)
        bound = 1.0 / np.sqrt(fi)
        w = jax.random.uniform(kw, (fi, fo), jnp.float32, -bound, bound)
        b = jax.random.uniform(kb, (fo,), jnp.float32, -bound, bound)
        return w, b

    keys = jax.random.split(key, 9)
    enc, dec = [], []
    for i, (fi, fo) in enumerate(dims):
        w, b = linear(keys[i], fi, fo)
        enc += [w, b]
    for i, (fi, fo) in enumerate(dims):
        w, b = linear(keys[4 + i], fi, fo)
        dec += [w, b]
    bound = 1.0 / np.sqrt(N * H)
    a_weight = jax.random.uniform(keys[8], (N, N * H), jnp.float32, -bound, bound)
    return tuple(enc), a_weight, tuple(dec)


def pack_params(enc_params, dec_params):
    """Pack the 16 MLP arrays into 4 stacked inputs."""
    def unpack(p):
        w1, b1, w2, b2, w3, b3, w4, b4 = p
        b4p = jnp.pad(b4.reshape(-1), (0, 64 - b4.size))
        return w1, (w2, w3), w4, (b1.reshape(-1), b2.reshape(-1), b3.reshape(-1), b4p)

    ew_in, ew_hid, ew_out, eb = unpack(enc_params)
    dw_in, dw_hid, dw_out, db = unpack(dec_params)
    w_in = jnp.stack([ew_in, dw_in])                   # (2, N, 64)
    w_hid = jnp.stack(list(ew_hid) + list(dw_hid))     # (4, 64, 64)
    w_out = jnp.stack([ew_out, dw_out])                # (2, 64, N)
    bias = jnp.stack(list(eb) + list(db))              # (8, 64)
    return w_in, w_hid, w_out, bias


def build_w_pows(a_weight, *, h, k):
    """Stack (A_aug^l).T[:, -n:] for l = 1..k along columns, split rows by window
    element -> shape (h, n, k*n). Host-side, done once."""
    a_weight = np.asarray(a_weight, np.float64)
    n = a_weight.shape[0]
    nh = n * h
    a_aug = np.zeros((nh, nh), np.float64)
    a_aug[:nh - n, :] = np.eye(nh)[n:, :]
    a_aug[nh - n:, :] = a_weight
    cols, p = [], a_aug
    for _ in range(k):
        cols.append(p.T[:, nh - n:])                   # (nh, n)
        p = p @ a_aug
    wstack = np.concatenate(cols, axis=1)              # (nh, k*n)
    return jnp.asarray(wstack.reshape(h, n, k * n).astype(np.float32))


# ------------------------- numpy (f64) reference -------------------------
def reference_forward(x, enc, a_weight, dec, *, h, k, m):
    x = np.asarray(x, np.float64)

    def mlp(v, p):
        w1, b1, w2, b2, w3, b3, w4, b4 = [np.asarray(q, np.float64) for q in p]
        y = np.maximum(v @ w1 + b1, 0.0)
        y = np.maximum(y @ w2 + b2, 0.0)
        y = np.maximum(y @ w3 + b3, 0.0)
        return y @ w4 + b4

    xe = mlp(x, enc)
    B, S, n = xe.shape
    nh = n * h
    a_aug = np.zeros((nh, nh))
    a_aug[:nh - n, :] = np.eye(nh)[n:, :]
    a_aug[nh - n:, :] = np.asarray(a_weight, np.float64)
    pows = [None, a_aug]
    for _ in range(2, k + 1):
        pows.append(pows[-1] @ a_aug)

    pred = np.zeros_like(xe)
    pred[:, :m, :] = xe[:, :m, :]
    for i in range(m, S):
        l = min(k, i - m + 1)
        z = xe[:, i - h:i, :].reshape(B, nh)
        pred[:, i, :] = np.einsum('ij,bj->bi', pows[l], z)[:, nh - n:]
    return mlp(pred, dec)


if __name__ == "__main__":
    key = jax.random.PRNGKey(0)
    kx, kp = jax.random.split(key)

    B, S = 2, 12
    x = jax.random.normal(kx, (B, S, N), jnp.float32)
    enc_params, a_weight, dec_params = init_params(kp)

    w_in, w_hid, w_out, bias = pack_params(enc_params, dec_params)
    w_pows = build_w_pows(a_weight, h=H, k=K)

    out = predictor_forward(x, w_in, w_hid, w_out, bias, w_pows, h=H, k=K, m=M)
    out = jax.block_until_ready(out)

    ref = reference_forward(np.asarray(x),
                            [np.asarray(p) for p in enc_params],
                            np.asarray(a_weight),
                            [np.asarray(p) for p in dec_params],
                            h=H, k=K, m=M)
    assert out.shape == (B, S, N)
    # DEFAULT (single-pass bf16) MXU precision: allow ~2e-2 vs the f64 reference.
    np.testing.assert_allclose(np.asarray(out), ref, rtol=2e-2, atol=2e-2)

    print("KERNEL_OK")
</pallas_src>

<mosaic_0001>
module attributes {stable_mosaic.version = 11 : i64} {
  func.func @predictor_kernel(%arg0: i32, %arg1: memref<2x96xf32, #tpu.memory_space<vmem>>, %arg2: memref<2x8x64xf32, #tpu.memory_space<vmem>>, %arg3: memref<4x64x64xf32, #tpu.memory_space<vmem>>, %arg4: memref<2x64x8xf32, #tpu.memory_space<vmem>>, %arg5: memref<8x64xf32, #tpu.memory_space<vmem>>, %arg6: memref<2x8x24xf32, #tpu.memory_space<vmem>>, %arg7: memref<2x96xf32, #tpu.memory_space<vmem>>) attributes {dimension_semantics = [#tpu.dimension_semantics<parallel>], iteration_bounds = array<i64: 1>, scalar_prefetch = 0 : i64, scratch_operands = 0 : i64, tpu.core_type = #tpu.core_type<tc>, window_params = [{transform_indices = @transform_0, window_bounds = array<i64: 2, 96>}, {pipeline_mode = #tpu.pipeline_mode<synchronous>, transform_indices = @transform_1, window_bounds = array<i64: 2, 8, 64>}, {pipeline_mode = #tpu.pipeline_mode<synchronous>, transform_indices = @transform_2, window_bounds = array<i64: 4, 64, 64>}, {pipeline_mode = #tpu.pipeline_mode<synchronous>, transform_indices = @transform_3, window_bounds = array<i64: 2, 64, 8>}, {pipeline_mode = #tpu.pipeline_mode<synchronous>, transform_indices = @transform_4, window_bounds = array<i64: 8, 64>}, {pipeline_mode = #tpu.pipeline_mode<synchronous>, transform_indices = @transform_5, window_bounds = array<i64: 2, 8, 24>}, {transform_indices = @transform_6, window_bounds = array<i64: 2, 96>}]} {
    %c0 = arith.constant 0 : index
    %c0_0 = arith.constant 0 : index
    %0 = vector.load %arg5[%c0, %c0_0] : memref<8x64xf32, #tpu.memory_space<vmem>>, vector<8x64xf32>
    %c0_1 = arith.constant 0 : index
    %c0_2 = arith.constant 0 : index
    %1 = vector.load %arg1[%c0_1, %c0_2] : memref<2x96xf32, #tpu.memory_space<vmem>>, vector<2x96xf32>
    %2 = vector.extract_strided_slice %1 {offsets = [0, 0], sizes = [2, 8], strides = [1, 1]} : vector<2x96xf32> to vector<2x8xf32>
    %3 = vector.extract_strided_slice %1 {offsets = [0, 8], sizes = [2, 8], strides = [1, 1]} : vector<2x96xf32> to vector<2x8xf32>
    %4 = vector.extract_strided_slice %1 {offsets = [0, 16], sizes = [2, 8], strides = [1, 1]} : vector<2x96xf32> to vector<2x8xf32>
    %5 = vector.extract_strided_slice %1 {offsets = [0, 24], sizes = [2, 8], strides = [1, 1]} : vector<2x96xf32> to vector<2x8xf32>
    %6 = vector.extract_strided_slice %1 {offsets = [0, 32], sizes = [2, 8], strides = [1, 1]} : vector<2x96xf32> to vector<2x8xf32>
    %7 = vector.extract_strided_slice %1 {offsets = [0, 40], sizes = [2, 8], strides = [1, 1]} : vector<2x96xf32> to vector<2x8xf32>
    %8 = vector.extract_strided_slice %1 {offsets = [0, 48], sizes = [2, 8], strides = [1, 1]} : vector<2x96xf32> to vector<2x8xf32>
    %9 = vector.extract_strided_slice %1 {offsets = [0, 56], sizes = [2, 8], strides = [1, 1]} : vector<2x96xf32> to vector<2x8xf32>
    %10 = vector.extract_strided_slice %1 {offsets = [0, 64], sizes = [2, 8], strides = [1, 1]} : vector<2x96xf32> to vector<2x8xf32>
    %11 = vector.extract_strided_slice %1 {offsets = [0, 72], sizes = [2, 8], strides = [1, 1]} : vector<2x96xf32> to vector<2x8xf32>
    %12 = vector.extract_strided_slice %1 {offsets = [0, 80], sizes = [2, 8], strides = [1, 1]} : vector<2x96xf32> to vector<2x8xf32>
    %13 = vector.extract_strided_slice %1 {offsets = [0, 88], sizes = [2, 8], strides = [1, 1]} : vector<2x96xf32> to vector<2x8xf32>
    %14 = vector.shape_cast %2 : vector<2x8xf32> to vector<2x1x8xf32>
    %15 = vector.shape_cast %3 : vector<2x8xf32> to vector<2x1x8xf32>
    %16 = vector.shape_cast %4 : vector<2x8xf32> to vector<2x1x8xf32>
    %17 = vector.shape_cast %5 : vector<2x8xf32> to vector<2x1x8xf32>
    %18 = vector.shape_cast %6 : vector<2x8xf32> to vector<2x1x8xf32>
    %19 = vector.shape_cast %7 : vector<2x8xf32> to vector<2x1x8xf32>
    %20 = vector.shape_cast %8 : vector<2x8xf32> to vector<2x1x8xf32>
    %21 = vector.shape_cast %9 : vector<2x8xf32> to vector<2x1x8xf32>
    %22 = vector.shape_cast %10 : vector<2x8xf32> to vector<2x1x8xf32>
    %23 = vector.shape_cast %11 : vector<2x8xf32> to vector<2x1x8xf32>
    %24 = vector.shape_cast %12 : vector<2x8xf32> to vector<2x1x8xf32>
    %25 = vector.shape_cast %13 : vector<2x8xf32> to vector<2x1x8xf32>
    %26 = tpu.concatenate %14, %15, %16, %17, %18, %19, %20, %21, %22, %23, %24, %25 in 1 : vector<2x1x8xf32>, vector<2x1x8xf32>, vector<2x1x8xf32>, vector<2x1x8xf32>, vector<2x1x8xf32>, vector<2x1x8xf32>, vector<2x1x8xf32>, vector<2x1x8xf32>, vector<2x1x8xf32>, vector<2x1x8xf32>, vector<2x1x8xf32>, vector<2x1x8xf32> -> vector<2x12x8xf32>
    %27 = vector.shape_cast %26 : vector<2x12x8xf32> to vector<24x8xf32>
    %c0_3 = arith.constant 0 : index
    %c0_4 = arith.constant 0 : index
    %c0_5 = arith.constant 0 : index
    %28 = vector.load %arg2[%c0_3, %c0_4, %c0_5] : memref<2x8x64xf32, #tpu.memory_space<vmem>>, vector<1x8x64xf32>
    %29 = vector.shape_cast %28 : vector<1x8x64xf32> to vector<8x64xf32>
    %cst = arith.constant dense<0.000000e+00> : vector<24x64xf32>
    %30 = tpu.matmul %27, %29, %cst {dimension_numbers = #tpu.dot_dimension_numbers<[1], [0], [0], [1], [0, 0, 1, 1], [], []>} : vector<24x8xf32>, vector<8x64xf32>, vector<24x64xf32> -> vector<24x64xf32>
    %31 = vector.extract_strided_slice %0 {offsets = [0, 0], sizes = [1, 64], strides = [1, 1]} : vector<8x64xf32> to vector<1x64xf32>
    %32 = vector.broadcast %31 : vector<1x64xf32> to vector<24x64xf32>
    %33 = arith.addf %30, %32 : vector<24x64xf32>
    %cst_6 = arith.constant 0.000000e+00 : f32
    %34 = vector.broadcast %cst_6 : f32 to vector<24x64xf32>
    %35 = arith.maximumf %33, %34 : vector<24x64xf32>
    %c0_7 = arith.constant 0 : index
    %c0_8 = arith.constant 0 : index
    %c0_9 = arith.constant 0 : index
    %36 = vector.load %arg3[%c0_7, %c0_8, %c0_9] : memref<4x64x64xf32, #tpu.memory_space<vmem>>, vector<1x64x64xf32>
    %37 = vector.shape_cast %36 : vector<1x64x64xf32> to vector<64x64xf32>
    %cst_10 = arith.constant dense<0.000000e+00> : vector<24x64xf32>
    %38 = tpu.matmul %35, %37, %cst_10 {dimension_numbers = #tpu.dot_dimension_numbers<[1], [0], [0], [1], [0, 0, 1, 1], [], []>} : vector<24x64xf32>, vector<64x64xf32>, vector<24x64xf32> -> vector<24x64xf32>
    %39 = vector.extract_strided_slice %0 {offsets = [1, 0], sizes = [1, 64], strides = [1, 1]} : vector<8x64xf32> to vector<1x64xf32>
    %40 = vector.broadcast %39 : vector<1x64xf32> to vector<24x64xf32>
    %41 = arith.addf %38, %40 : vector<24x64xf32>
    %cst_11 = arith.constant 0.000000e+00 : f32
    %42 = vector.broadcast %cst_11 : f32 to vector<24x64xf32>
    %43 = arith.maximumf %41, %42 : vector<24x64xf32>
    %c1 = arith.constant 1 : index
    %c0_12 = arith.constant 0 : index
    %c0_13 = arith.constant 0 : index
    %44 = vector.load %arg3[%c1, %c0_12, %c0_13] : memref<4x64x64xf32, #tpu.memory_space<vmem>>, vector<1x64x64xf32>
    %45 = vector.shape_cast %44 : vector<1x64x64xf32> to vector<64x64xf32>
    %cst_14 = arith.constant dense<0.000000e+00> : vector<24x64xf32>
    %46 = tpu.matmul %43, %45, %cst_14 {dimension_numbers = #tpu.dot_dimension_numbers<[1], [0], [0], [1], [0, 0, 1, 1], [], []>} : vector<24x64xf32>, vector<64x64xf32>, vector<24x64xf32> -> vector<24x64xf32>
    %47 = vector.extract_strided_slice %0 {offsets = [2, 0], sizes = [1, 64], strides = [1, 1]} : vector<8x64xf32> to vector<1x64xf32>
    %48 = vector.broadcast %47 : vector<1x64xf32> to vector<24x64xf32>
    %49 = arith.addf %46, %48 : vector<24x64xf32>
    %cst_15 = arith.constant 0.000000e+00 : f32
    %50 = vector.broadcast %cst_15 : f32 to vector<24x64xf32>
    %51 = arith.maximumf %49, %50 : vector<24x64xf32>
    %c0_16 = arith.constant 0 : index
    %c0_17 = arith.constant 0 : index
    %c0_18 = arith.constant 0 : index
    %52 = vector.load %arg4[%c0_16, %c0_17, %c0_18] : memref<2x64x8xf32, #tpu.memory_space<vmem>>, vector<1x64x8xf32>
    %53 = vector.shape_cast %52 : vector<1x64x8xf32> to vector<64x8xf32>
    %cst_19 = arith.constant dense<0.000000e+00> : vector<24x8xf32>
    %54 = tpu.matmul %51, %53, %cst_19 {dimension_numbers = #tpu.dot_dimension_numbers<[1], [0], [0], [1], [0, 0, 1, 1], [], []>} : vector<24x64xf32>, vector<64x8xf32>, vector<24x8xf32> -> vector<24x8xf32>
    %55 = vector.extract_strided_slice %0 {offsets = [3, 0], sizes = [1, 8], strides = [1, 1]} : vector<8x64xf32> to vector<1x8xf32>
    %56 = vector.broadcast %55 : vector<1x8xf32> to vector<24x8xf32>
    %57 = arith.addf %54, %56 : vector<24x8xf32>
    %58 = vector.shape_cast %57 : vector<24x8xf32> to vector<2x12x8xf32>
    %59 = vector.extract_strided_slice %58 {offsets = [0, 4, 0], sizes = [2, 6, 8], strides = [1, 1, 1]} : vector<2x12x8xf32> to vector<2x6x8xf32>
    %60 = vector.shape_cast %59 : vector<2x6x8xf32> to vector<12x8xf32>
    %c0_20 = arith.constant 0 : index
    %c0_21 = arith.constant 0 : index
    %c0_22 = arith.constant 0 : index
    %61 = vector.load %arg6[%c0_20, %c0_21, %c0_22] : memref<2x8x24xf32, #tpu.memory_space<vmem>>, vector<1x8x24xf32>
    %62 = vector.shape_cast %61 : vector<1x8x24xf32> to vector<8x24xf32>
    %cst_23 = arith.constant dense<0.000000e+00> : vector<12x24xf32>
    %63 = tpu.matmul %60, %62, %cst_23 {dimension_numbers = #tpu.dot_dimension_numbers<[1], [0], [0], [1], [0, 0, 1, 1], [], []>} : vector<12x8xf32>, vector<8x24xf32>, vector<12x24xf32> -> vector<12x24xf32>
    %64 = vector.extract_strided_slice %58 {offsets = [0, 5, 0], sizes = [2, 6, 8], strides = [1, 1, 1]} : vector<2x12x8xf32> to vector<2x6x8xf32>
    %65 = vector.shape_cast %64 : vector<2x6x8xf32> to vector<12x8xf32>
    %c1_24 = arith.constant 1 : index
    %c0_25 = arith.constant 0 : index
    %c0_26 = arith.constant 0 : index
    %66 = vector.load %arg6[%c1_24, %c0_25, %c0_26] : memref<2x8x24xf32, #tpu.memory_space<vmem>>, vector<1x8x24xf32>
    %67 = vector.shape_cast %66 : vector<1x8x24xf32> to vector<8x24xf32>
    %cst_27 = arith.constant dense<0.000000e+00> : vector<12x24xf32>
    %68 = tpu.matmul %65, %67, %cst_27 {dimension_numbers = #tpu.dot_dimension_numbers<[1], [0], [0], [1], [0, 0, 1, 1], [], []>} : vector<12x8xf32>, vector<8x24xf32>, vector<12x24xf32> -> vector<12x24xf32>
    %69 = arith.addf %63, %68 : vector<12x24xf32>
    %70 = vector.shape_cast %69 : vector<12x24xf32> to vector<2x6x24xf32>
    %71 = vector.extract_strided_slice %70 {offsets = [0, 0, 16], sizes = [2, 6, 8], strides = [1, 1, 1]} : vector<2x6x24xf32> to vector<2x6x8xf32>
    %72 = tpu.iota {dimensions = array<i32: 1>} : vector<2x6x8xi32>
    %c0_i32 = arith.constant 0 : i32
    %73 = vector.broadcast %c0_i32 : i32 to vector<2x6x8xi32>
    %74 = arith.cmpi eq, %72, %73 : vector<2x6x8xi32>
    %75 = vector.extract_strided_slice %70 {offsets = [0, 0, 0], sizes = [2, 6, 8], strides = [1, 1, 1]} : vector<2x6x24xf32> to vector<2x6x8xf32>
    %76 = arith.select %74, %75, %71 : vector<2x6x8xi1>, vector<2x6x8xf32>
    %c1_i32 = arith.constant 1 : i32
    %77 = vector.broadcast %c1_i32 : i32 to vector<2x6x8xi32>
    %78 = arith.cmpi eq, %72, %77 : vector<2x6x8xi32>
    %79 = vector.extract_strided_slice %70 {offsets = [0, 0, 8], sizes = [2, 6, 8], strides = [1, 1, 1]} : vector<2x6x24xf32> to vector<2x6x8xf32>
    %80 = arith.select %78, %79, %76 : vector<2x6x8xi1>, vector<2x6x8xf32>
    %81 = vector.extract_strided_slice %58 {offsets = [0, 0, 0], sizes = [2, 6, 8], strides = [1, 1, 1]} : vector<2x12x8xf32> to vector<2x6x8xf32>
    %82 = tpu.concatenate %81, %80 in 1 : vector<2x6x8xf32>, vector<2x6x8xf32> -> vector<2x12x8xf32>
    %83 = vector.shape_cast %82 : vector<2x12x8xf32> to vector<24x8xf32>
    %c1_28 = arith.constant 1 : index
    %c0_29 = arith.constant 0 : index
    %c0_30 = arith.constant 0 : index
    %84 = vector.load %arg2[%c1_28, %c0_29, %c0_30] : memref<2x8x64xf32, #tpu.memory_space<vmem>>, vector<1x8x64xf32>
    %85 = vector.shape_cast %84 : vector<1x8x64xf32> to vector<8x64xf32>
    %cst_31 = arith.constant dense<0.000000e+00> : vector<24x64xf32>
    %86 = tpu.matmul %83, %85, %cst_31 {dimension_numbers = #tpu.dot_dimension_numbers<[1], [0], [0], [1], [0, 0, 1, 1], [], []>} : vector<24x8xf32>, vector<8x64xf32>, vector<24x64xf32> -> vector<24x64xf32>
    %87 = vector.extract_strided_slice %0 {offsets = [4, 0], sizes = [1, 64], strides = [1, 1]} : vector<8x64xf32> to vector<1x64xf32>
    %88 = vector.broadcast %87 : vector<1x64xf32> to vector<24x64xf32>
    %89 = arith.addf %86, %88 : vector<24x64xf32>
    %cst_32 = arith.constant 0.000000e+00 : f32
    %90 = vector.broadcast %cst_32 : f32 to vector<24x64xf32>
    %91 = arith.maximumf %89, %90 : vector<24x64xf32>
    %c2 = arith.constant 2 : index
    %c0_33 = arith.constant 0 : index
    %c0_34 = arith.constant 0 : index
    %92 = vector.load %arg3[%c2, %c0_33, %c0_34] : memref<4x64x64xf32, #tpu.memory_space<vmem>>, vector<1x64x64xf32>
    %93 = vector.shape_cast %92 : vector<1x64x64xf32> to vector<64x64xf32>
    %cst_35 = arith.constant dense<0.000000e+00> : vector<24x64xf32>
    %94 = tpu.matmul %91, %93, %cst_35 {dimension_numbers = #tpu.dot_dimension_numbers<[1], [0], [0], [1], [0, 0, 1, 1], [], []>} : vector<24x64xf32>, vector<64x64xf32>, vector<24x64xf32> -> vector<24x64xf32>
    %95 = vector.extract_strided_slice %0 {offsets = [5, 0], sizes = [1, 64], strides = [1, 1]} : vector<8x64xf32> to vector<1x64xf32>
    %96 = vector.broadcast %95 : vector<1x64xf32> to vector<24x64xf32>
    %97 = arith.addf %94, %96 : vector<24x64xf32>
    %cst_36 = arith.constant 0.000000e+00 : f32
    %98 = vector.broadcast %cst_36 : f32 to vector<24x64xf32>
    %99 = arith.maximumf %97, %98 : vector<24x64xf32>
    %c3 = arith.constant 3 : index
    %c0_37 = arith.constant 0 : index
    %c0_38 = arith.constant 0 : index
    %100 = vector.load %arg3[%c3, %c0_37, %c0_38] : memref<4x64x64xf32, #tpu.memory_space<vmem>>, vector<1x64x64xf32>
    %101 = vector.shape_cast %100 : vector<1x64x64xf32> to vector<64x64xf32>
    %cst_39 = arith.constant dense<0.000000e+00> : vector<24x64xf32>
    %102 = tpu.matmul %99, %101, %cst_39 {dimension_numbers = #tpu.dot_dimension_numbers<[1], [0], [0], [1], [0, 0, 1, 1], [], []>} : vector<24x64xf32>, vector<64x64xf32>, vector<24x64xf32> -> vector<24x64xf32>
    %103 = vector.extract_strided_slice %0 {offsets = [6, 0], sizes = [1, 64], strides = [1, 1]} : vector<8x64xf32> to vector<1x64xf32>
    %104 = vector.broadcast %103 : vector<1x64xf32> to vector<24x64xf32>
    %105 = arith.addf %102, %104 : vector<24x64xf32>
    %cst_40 = arith.constant 0.000000e+00 : f32
    %106 = vector.broadcast %cst_40 : f32 to vector<24x64xf32>
    %107 = arith.maximumf %105, %106 : vector<24x64xf32>
    %c1_41 = arith.constant 1 : index
    %c0_42 = arith.constant 0 : index
    %c0_43 = arith.constant 0 : index
    %108 = vector.load %arg4[%c1_41, %c0_42, %c0_43] : memref<2x64x8xf32, #tpu.memory_space<vmem>>, vector<1x64x8xf32>
    %109 = vector.shape_cast %108 : vector<1x64x8xf32> to vector<64x8xf32>
    %cst_44 = arith.constant dense<0.000000e+00> : vector<24x8xf32>
    %110 = tpu.matmul %107, %109, %cst_44 {dimension_numbers = #tpu.dot_dimension_numbers<[1], [0], [0], [1], [0, 0, 1, 1], [], []>} : vector<24x64xf32>, vector<64x8xf32>, vector<24x8xf32> -> vector<24x8xf32>
    %111 = vector.extract_strided_slice %0 {offsets = [7, 0], sizes = [1, 8], strides = [1, 1]} : vector<8x64xf32> to vector<1x8xf32>
    %112 = vector.broadcast %111 : vector<1x8xf32> to vector<24x8xf32>
    %113 = arith.addf %110, %112 : vector<24x8xf32>
    %114 = vector.shape_cast %113 : vector<24x8xf32> to vector<2x12x8xf32>
    %115 = vector.extract_strided_slice %114 {offsets = [0, 0, 0], sizes = [2, 1, 8], strides = [1, 1, 1]} : vector<2x12x8xf32> to vector<2x1x8xf32>
    %116 = vector.shape_cast %115 : vector<2x1x8xf32> to vector<2x8xf32>
    %117 = vector.extract_strided_slice %114 {offsets = [0, 1, 0], sizes = [2, 1, 8], strides = [1, 1, 1]} : vector<2x12x8xf32> to vector<2x1x8xf32>
    %118 = vector.shape_cast %117 : vector<2x1x8xf32> to vector<2x8xf32>
    %119 = vector.extract_strided_slice %114 {offsets = [0, 2, 0], sizes = [2, 1, 8], strides = [1, 1, 1]} : vector<2x12x8xf32> to vector<2x1x8xf32>
    %120 = vector.shape_cast %119 : vector<2x1x8xf32> to vector<2x8xf32>
    %121 = vector.extract_strided_slice %114 {offsets = [0, 3, 0], sizes = [2, 1, 8], strides = [1, 1, 1]} : vector<2x12x8xf32> to vector<2x1x8xf32>
    %122 = vector.shape_cast %121 : vector<2x1x8xf32> to vector<2x8xf32>
    %123 = vector.extract_strided_slice %114 {offsets = [0, 4, 0], sizes = [2, 1, 8], strides = [1, 1, 1]} : vector<2x12x8xf32> to vector<2x1x8xf32>
    %124 = vector.shape_cast %123 : vector<2x1x8xf32> to vector<2x8xf32>
    %125 = vector.extract_strided_slice %114 {offsets = [0, 5, 0], sizes = [2, 1, 8], strides = [1, 1, 1]} : vector<2x12x8xf32> to vector<2x1x8xf32>
    %126 = vector.shape_cast %125 : vector<2x1x8xf32> to vector<2x8xf32>
    %127 = vector.extract_strided_slice %114 {offsets = [0, 6, 0], sizes = [2, 1, 8], strides = [1, 1, 1]} : vector<2x12x8xf32> to vector<2x1x8xf32>
    %128 = vector.shape_cast %127 : vector<2x1x8xf32> to vector<2x8xf32>
    %129 = vector.extract_strided_slice %114 {offsets = [0, 7, 0], sizes = [2, 1, 8], strides = [1, 1, 1]} : vector<2x12x8xf32> to vector<2x1x8xf32>
    %130 = vector.shape_cast %129 : vector<2x1x8xf32> to vector<2x8xf32>
    %131 = vector.extract_strided_slice %114 {offsets = [0, 8, 0], sizes = [2, 1, 8], strides = [1, 1, 1]} : vector<2x12x8xf32> to vector<2x1x8xf32>
    %132 = vector.shape_cast %131 : vector<2x1x8xf32> to vector<2x8xf32>
    %133 = vector.extract_strided_slice %114 {offsets = [0, 9, 0], sizes = [2, 1, 8], strides = [1, 1, 1]} : vector<2x12x8xf32> to vector<2x1x8xf32>
    %134 = vector.shape_cast %133 : vector<2x1x8xf32> to vector<2x8xf32>
    %135 = vector.extract_strided_slice %114 {offsets = [0, 10, 0], sizes = [2, 1, 8], strides = [1, 1, 1]} : vector<2x12x8xf32> to vector<2x1x8xf32>
    %136 = vector.shape_cast %135 : vector<2x1x8xf32> to vector<2x8xf32>
    %137 = vector.extract_strided_slice %114 {offsets = [0, 11, 0], sizes = [2, 1, 8], strides = [1, 1, 1]} : vector<2x12x8xf32> to vector<2x1x8xf32>
    %138 = vector.shape_cast %137 : vector<2x1x8xf32> to vector<2x8xf32>
    %139 = tpu.concatenate %116, %118, %120, %122, %124, %126, %128, %130, %132, %134, %136, %138 in 1 : vector<2x8xf32>, vector<2x8xf32>, vector<2x8xf32>, vector<2x8xf32>, vector<2x8xf32>, vector<2x8xf32>, vector<2x8xf32>, vector<2x8xf32>, vector<2x8xf32>, vector<2x8xf32>, vector<2x8xf32>, vector<2x8xf32> -> vector<2x96xf32>
    %c0_45 = arith.constant 0 : index
    %c0_46 = arith.constant 0 : index
    %140 = vector.load %arg7[%c0_45, %c0_46] : memref<2x96xf32, #tpu.memory_space<vmem>>, vector<2x96xf32>
    tpu.vector_store %arg7[%c0_45, %c0_46], %139 {strides = array<i32>} : memref<2x96xf32, #tpu.memory_space<vmem>>, vector<2x96xf32>,
    return
  }
  func.func @transform_0(%arg0: i32) -> (i32, i32) {
    %c0_i32 = arith.constant 0 : i32
    %c0_i32_0 = arith.constant 0 : i32
    return %arg0, %c0_i32 : i32, i32
  }
  func.func @transform_1(%arg0: i32) -> (i32, i32, i32) {
    %c0_i32 = arith.constant 0 : i32
    %c0_i32_0 = arith.constant 0 : i32
    %c0_i32_1 = arith.constant 0 : i32
    %c0_i32_2 = arith.constant 0 : i32
    return %c0_i32, %c0_i32_0, %c0_i32_1 : i32, i32, i32
  }
  func.func @transform_2(%arg0: i32) -> (i32, i32, i32) {
    %c0_i32 = arith.constant 0 : i32
    %c0_i32_0 = arith.constant 0 : i32
    %c0_i32_1 = arith.constant 0 : i32
    %c0_i32_2 = arith.constant 0 : i32
    return %c0_i32, %c0_i32_0, %c0_i32_1 : i32, i32, i32
  }
  func.func @transform_3(%arg0: i32) -> (i32, i32, i32) {
    %c0_i32 = arith.constant 0 : i32
    %c0_i32_0 = arith.constant 0 : i32
    %c0_i32_1 = arith.constant 0 : i32
    %c0_i32_2 = arith.constant 0 : i32
    return %c0_i32, %c0_i32_0, %c0_i32_1 : i32, i32, i32
  }
  func.func @transform_4(%arg0: i32) -> (i32, i32) {
    %c0_i32 = arith.constant 0 : i32
    %c0_i32_0 = arith.constant 0 : i32
    %c0_i32_1 = arith.constant 0 : i32
    return %c0_i32, %c0_i32_0 : i32, i32
  }
  func.func @transform_5(%arg0: i32) -> (i32, i32, i32) {
    %c0_i32 = arith.constant 0 : i32
    %c0_i32_0 = arith.constant 0 : i32
    %c0_i32_1 = arith.constant 0 : i32
    %c0_i32_2 = arith.constant 0 : i32
    return %c0_i32, %c0_i32_0, %c0_i32_1 : i32, i32, i32
  }
  func.func @transform_6(%arg0: i32) -> (i32, i32) {
    %c0_i32 = arith.constant 0 : i32
    %c0_i32_0 = arith.constant 0 : i32
    return %arg0, %c0_i32 : i32, i32
  }
}

</mosaic_0001>

<bundles_post_ra>
// kernel: predictor_forward.1
= control target key start
LH: loop header
LB: loop body
LE: loop exit
PB: predicated region body
PF: predicated region fallthrough
CT: control target
= control target key end

     0   :  { %11 = vsyncpa [#allocation3], 0  ;;  %s1961_s21 = smov [#allocation2]   ;;  %s2393_s0 = inlined_call_operand.vmem [shape: f32[2,96], index: 0, kind: input, shape index: {}]   ;;  %s2394_s1 = inlined_call_operand.vmem [shape: f32[2,8,64], index: 1, kind: input, shape index: {}]   ;;  %s2395_s2 = inlined_call_operand.hbm [shape: f32[4,64,64], index: 2, kind: input, shape index: {}]   ;;  %s2396_s3 = inlined_call_operand.vmem [shape: f32[2,64,8], index: 3, kind: input, shape index: {}]   ;;  %s2397_s4 = inlined_call_operand.vmem [shape: f32[8,64], index: 4, kind: input, shape index: {}]   ;;  %s2398_s5 = inlined_call_operand.vmem [shape: f32[2,8,24], index: 5, kind: input, shape index: {}]   ;;  %s2399_s6 = inlined_call_operand.vmem [shape: f32[2,96], index: 6, kind: output, shape index: {}]  }
   0x1   :  { %s21_s22 = sshll.u32 %s1961_s21, 4  ;;  %s1937_s25 = scalar_lea.hbm %s2395_s2, 4096  ;;  %s22_s22 = int_to_ptr.vmem [resolvable:$true] %s21_s22 }
   0x2   :  { %p1938_p0 = scmp.ne.s32.totalorder %s2395_s2, %s1937_s25  ;;  %p1941_p1 = scmp.lt.u32.totalorder %s1937_s25, %s2395_s2 }
   0x4   :  { %p1943_p2 = pnand %p1941_p1, %p1938_p0 }
   0x6   :  { %1946 = shalt.err (!%p1943_p2)
}
   0x7   :  { %s1947_s30 = scalar_lea.vmem %s22_s22, 4096  ;;  %p1952_p4 = scmp.lt.s32.totalorder %s22_s22, %s22_s22 }
   0x8   :  { %p1948_p3 = scmp.ne.s32.totalorder %s22_s22, %s1947_s30  ;;  %p1953_p5 = scmp.lt.s32.totalorder %s1947_s30, %s1947_s30 }
   0xa   :  { %p1954_p6 = por %p1953_p5, %p1952_p4 }
   0xc   :  { %p1955_p7 = pnand %p1954_p6, %p1948_p3 }
   0xe   :  { %1958 = shalt.err (!%p1955_p7)
}
   0xf   :  { %s1962_s7 = smov 128   ;;  %s1963_s8 = smov 8  }
  0x10   :  { %27 = dma.hbm_to_vmem [thread:$0]  %s2395_s2, 4096, %s22_s22, [#allocation3], %s1962_s7, %s1962_s7, %s1963_s8  }
  0x11   :  { %1959 = dma.done.wait [#allocation3], 4096  }
  0x12   :  { %1960 = vsyncadd [#allocation3], 4294963200  ;;  %v51_v0 = vlaneseq  ;;  %v1964_v1 = vmov 1966171168   ;;  %s1965_s2 = smov 104   ;;  %s1966_s13 = smov 120  }
  0x13   :  { %v49_v2 = vunpack.c.l.s4 %v1964_v1  ;;  %v1538_v7 = vld.sshfl [vmem:[%s2393_s0] sm:$0x11 pattern:$0x75316420]  ;;  %v1967_v11 = vmov 0.0   ;;  %vm1968_vm0 = vmmov 0  }
  0x14   :  { %v2031_v3 = vshrl.u32 %v51_v0, 7  ;;  %v47_v10 = vcombine.high %v1538_v7, %v1538_v7  ;;  %1659 = vmatprep.subr.mxu0 %v1967_v11  ;;  %v171_v12 = vld [vmem:[%s2394_s1] sm:$0xff]  ;;  %1661 = vmatprep.mubr.msk.f32.mxu0 %vm1968_vm0, %v1967_v11  ;;  %s1969_s0 = smov 96   ;;  %s1970_s16 = smov 112   ;;  %v270_v16 = vld [vmem:[#allocation2 + $0x8] sm:$0xff]  ;;  %v271_v17 = vld [vmem:[#allocation2 + $0x10] sm:$0xff] }
  0x15   :  { %v50_v4 = vunpack.c.0.s8 %v49_v2  ;;  %1660 = vmatpush3.msra.mxu0 %v171_v12  ;;  %1686 = vmatprep.mubr.msk.f32.mxu1 %vm1968_vm0, %v1967_v11  ;;  %s1971_s17 = smov 80   ;;  %s1972_s18 = smov 88   ;;  %v269_v15 = vld [vmem:[#allocation2] sm:$0xff]  ;;  %v272_v19 = vld [vmem:[#allocation2 + $0x18] sm:$0xff]  ;;  %v1978_v20 = vmov 0.0|0.0   ;;  %v274_v23 = vld [vmem:[#allocation2 + $0x28] sm:$0xff] }
  0x16   :  { %v2035_v6 = vsub.s32 0, %v2031_v3  ;;  %s1973_s19 = smov 72   ;;  %s1974_s20 = smov 56   ;;  %v1842_v18 = vpack.c.bf16 %v270_v16, %v269_v15  ;;  %1841 = vmatprep.subr.bf16.mxu1 %v1978_v20  ;;  %1853 = vmatprep.subr.bf16.mxu0 %v1978_v20  ;;  %v1845_v21 = vpack.c.bf16 %v272_v19, %v271_v17  ;;  %v273_v22 = vld [vmem:[#allocation2 + $0x20] sm:$0xff]  ;;  %vm138_vm1 = vcmask 1040384   ;;  %v276_v12 = vld [vmem:[#allocation2 + $0x38] sm:$0xff] }
  0x17   :  { %v53_v5 = vsub.s32 %v50_v4, %v2031_v3  ;;  %s1975_s21 = smov 64   ;;  %s1976_s22 = smov 48   ;;  %v1848_v24 = vpack.c.bf16 %v274_v23, %v273_v22  ;;  %vm141_vm2 = vcmask 1041408   ;;  %vm144_vm3 = vcmask 1042432   ;;  %v376_v15 = vld [vmem:[#allocation2 + $0x48] sm:$0xff]  ;;  %v377_v16 = vld [vmem:[#allocation2 + $0x50] sm:$0xff] }
  0x18   :  { %s1977_s23 = smov 40   ;;  %1843 = vmatpush3.bf16.msra.mxu1 %v1842_v18  ;;  %vm147_vm4 = vcmask 1043456   ;;  %vm150_vm5 = vcmask 1044480   ;;  %vm153_vm6 = vcmask 1045504   ;;  %vm156_vm7 = vcmask 1046528   ;;  %v378_v18 = vld [vmem:[#allocation2 + $0x58] sm:$0xff] }
  0x19   :  { %v2040_v8 = vrot.slane %v1538_v7, %v53_v5  ;;  %v2052_v13 = vrot.slane %v47_v10, %v53_v5  ;;  %1844 = vmatprep.subr.bf16.mxu1 %v1978_v20  ;;  %vm179_vm8 = vcmask 64512   ;;  %v275_v10 = vld [vmem:[#allocation2 + $0x30] sm:$0xff]  ;;  %v1857_v19 = vpack.c.bf16 %v378_v18, %v377_v16  ;;  %v380_v22 = vld [vmem:[#allocation2 + $0x68] sm:$0xff] }
  0x1a   :  { %vm281_vm9 = vcmask 523264   ;;  %vm619_vm10 = vcmask 1042434   ;;  %vm621_vm12 = vcmask 1044484   ;;  %vm623_vm14 = vcmask 1046534  }
  0x1b   :  { %v67_v9 = vrot.slane %v2040_v8, %v2035_v6  ;;  %v71_v14 = vrot.slane %v2052_v13, %v2035_v6  ;;  %vm620_vm11 = vmor %vm138_vm1, %vm619_vm10  ;;  %vm1522_vm10 = vcmask 457728  }
  0x1c   :  { %1846 = vmatpush3.bf16.msra.mxu1 %v1845_v21  ;;  %v379_v21 = vld [vmem:[#allocation2 + $0x60] sm:$0xff]  ;;  %vm622_vm13 = vmor %vm620_vm11, %vm621_vm12  ;;  %vm1525_vm11 = vcmask 588800   ;;  %vm1529_vm12 = vcmask 719872  }
  0x1d   :  { %84 = vrot.lane.b32.xlu1 %v67_v9, %s1965_s2  ;;  %72 = vrot.lane.b32.xlu0 %v67_v9, %s1966_s13  ;;  %v1860_v23 = vpack.c.bf16 %v380_v22, %v379_v21  ;;  %v1553_v21 = vld [vmem:[%s2398_s5 + $0x8] sm:$0xff]  ;;  %v2190_v22 = vld [vmem:[%s2398_s5] sm:$0xff]  ;;  %vm2213_vm15 = vmor %vm622_vm13, %vm623_vm14  ;;  %vm1531_vm13 = vcmask 779264  }
  0x1e   :  { %1847 = vmatprep.subr.bf16.mxu1 %v1978_v20 }
  0x20   :  { %1849 = vmatpush3.bf16.msra.mxu1 %v1848_v24  ;;  %v2117_v24 = vld [vmem:[%s2397_s4] sm:$0xff]  ;;  %s1982_s4 = smov 32  }
  0x21   :  { %90 = vrot.lane.b32.xlu1 %v67_v9, %s1969_s0  ;;  %78 = vrot.lane.b32.xlu0 %v67_v9, %s1970_s16 }
  0x22   :  { %1850 = vmatprep.subr.bf16.mxu1 %v1978_v20 }
  0x25   :  { %102 = vrot.lane.b32.xlu1 %v67_v9, %s1971_s17  ;;  %96 = vrot.lane.b32.xlu0 %v67_v9, %s1972_s18 }
  0x29   :  { %108 = vrot.lane.b32.xlu1 %v67_v9, %s1973_s19  ;;  %74 = vrot.lane.b32.xlu0 %v71_v14, %s1966_s13 }
  0x2d   :  { %86 = vrot.lane.b32.xlu1 %v71_v14, %s1965_s2  ;;  %80 = vrot.lane.b32.xlu0 %v71_v14, %s1970_s16 }
  0x31   :  { %98 = vrot.lane.b32.xlu1 %v71_v14, %s1972_s18  ;;  %92 = vrot.lane.b32.xlu0 %v71_v14, %s1969_s0 }
  0x35   :  { %120 = vrot.lane.b32.xlu1 %v67_v9, %s1974_s20  ;;  %114 = vrot.lane.b32.xlu0 %v67_v9, %s1975_s21 }
  0x39   :  { %126 = vrot.lane.b32.xlu1 %v67_v9, %s1976_s22  ;;  %104 = vrot.lane.b32.xlu0 %v71_v14, %s1971_s17 }
  0x3d   :  { %132 = vrot.lane.b32.xlu1 %v67_v9, %s1977_s23  ;;  %110 = vrot.lane.b32.xlu0 %v71_v14, %s1973_s19 }
  0x41   :  { %122 = vrot.lane.b32.xlu1 %v71_v14, %s1974_s20  ;;  %116 = vrot.lane.b32.xlu0 %v71_v14, %s1975_s21 }
  0x45   :  { %128 = vrot.lane.b32.xlu0 %v71_v14, %s1976_s22  ;;  %134 = vrot.lane.b32.xlu1 %v71_v14, %s1977_s23  ;;  %v375_v14 = vld [vmem:[#allocation2 + $0x40] sm:$0xff] }
  0x46   :  { %v1854_v17 = vpack.c.bf16 %v376_v15, %v375_v14 }
  0x8f   :  { %v85_v25 = vpop.permute.xlu1 %84  ;;  %v73_v26 = vpop.permute.xlu0 %72 }
  0x90   :  { %v139_v27 = vsel %vm138_vm1, %v2040_v8, %v73_v26 }
  0x93   :  { %v91_v28 = vpop.permute.xlu1 %90  ;;  %v79_v29 = vpop.permute.xlu0 %78 }
  0x94   :  { %v142_v30 = vsel %vm141_vm2, %v139_v27, %v79_v29 }
  0x95   :  { %v145_v31 = vsel %vm144_vm3, %v142_v30, %v85_v25  ;;  %v175_v25 = vrot.slane %v2117_v24, %v2035_v6 }
  0x96   :  { %v148_v32 = vsel %vm147_vm4, %v145_v31, %v91_v28 }
  0x97   :  { %v103_v33 = vpop.permute.xlu1 %102  ;;  %v97_v34 = vpop.permute.xlu0 %96 }
  0x98   :  { %v151_v35 = vsel %vm150_vm5, %v148_v32, %v97_v34 }
  0x99   :  { %v154_v37 = vsel %vm153_vm6, %v151_v35, %v103_v33 }
  0x9b   :  { %v109_v36 = vpop.permute.xlu1 %108  ;;  %v75_v38 = vpop.permute.xlu0 %74 }
  0x9c   :  { %v157_v39 = vsel %vm156_vm7, %v154_v37, %v109_v36  ;;  %v140_v46 = vsel %vm138_vm1, %v2052_v13, %v75_v38  ;;  %v1851_v13 = vpack.c.bf16 %v276_v12, %v275_v10  ;;  %v381_v38 = vld [vmem:[#allocation2 + $0x70] sm:$0xff] }
  0x9d   :  { %v169_v40 = vcombine.high %v157_v39, %v157_v39 }
  0x9e   :  { %1852 = vmatpush3.bf16.msra.mxu1 %v1851_v13 }
  0x9f   :  { %v176_v41 = vcombine.low %v157_v39, %v169_v40  ;;  %v87_v42 = vpop.permute.xlu1 %86  ;;  %v81_v43 = vpop.permute.xlu0 %80  ;;  %1865 = vmatprep.subr.bf16.mxu1 %v1978_v20  ;;  %v382_v39 = vld [vmem:[#allocation2 + $0x78] sm:$0xff] }
  0xa0   :  { %v143_v47 = vsel %vm141_vm2, %v140_v46, %v81_v43  ;;  %v1863_v40 = vpack.c.bf16 %v382_v39, %v381_v38  ;;  %v481_v43 = vld [vmem:[%s2396_s3 + $0x10] sm:$0xff] }
  0xa1   :  { %1662 = vmatmul.mubr.msk.f32.vlgmr.msra.gmra.mrb[0].mxu0 %vm179_vm8, %v176_v41  ;;  %v146_v50 = vsel %vm144_vm3, %v143_v47, %v87_v42  ;;  %v479_v41 = vld [vmem:[%s2396_s3] sm:$0xff]  ;;  %v480_v42 = vld [vmem:[%s2396_s3 + $0x8] sm:$0xff] }
  0xa2   :  { %1664 = vmatprep.mubr.msk.f32.mxu0 %vm1968_vm0, %v1967_v11  ;;  %1855 = vmatpush3.bf16.msra.mxu0 %v1854_v17  ;;  %v483_v47 = vld [vmem:[%s2396_s3 + $0x20] sm:$0xff] }
  0xa3   :  { %v99_v44 = vpop.permute.xlu1 %98  ;;  %v93_v45 = vpop.permute.xlu0 %92  ;;  %1856 = vmatprep.subr.bf16.mxu0 %v1978_v20 }
  0xa4   :  { %v149_v51 = vsel %vm147_vm4, %v146_v50, %v93_v45  ;;  %v482_v45 = vld [vmem:[%s2396_s3 + $0x18] sm:$0xff]  ;;  %v2152_v50 = vsub.s32 1, %v2031_v3  ;;  %vm1514_vm4 = vcmask 195584  }
  0xa5   :  { %v152_v55 = vsel %vm150_vm5, %v149_v51, %v99_v44  ;;  %v1866_v44 = vpack.c.bf16 %v480_v42, %v479_v41  ;;  %v1869_v46 = vpack.c.bf16 %v482_v45, %v481_v43  ;;  %vm1516_vm5 = vcmask 261120  }
  0xa6   :  { %1858 = vmatpush3.bf16.msra.mxu0 %v1857_v19  ;;  %v280_v51 = vrot.slane %v2117_v24, %v2152_v50 }
  0xa7   :  { %v121_v48 = vpop.permute.xlu1 %120  ;;  %v115_v49 = vpop.permute.xlu0 %114  ;;  %1859 = vmatprep.subr.bf16.mxu0 %v1978_v20 }
  0xa8   :  { %v159_v54 = vsel %vm138_vm1, %v115_v49, %v121_v48  ;;  %v484_v48 = vld [vmem:[%s2396_s3 + $0x28] sm:$0xff] }
  0xa9   :  { %v1872_v49 = vpack.c.bf16 %v484_v48, %v483_v47 }
  0xaa   :  { %1861 = vmatpush3.bf16.msra.mxu0 %v1860_v23  ;;  %v2194_v23 = vsub.s32 3, %v2031_v3 }
  0xab   :  { %v127_v52 = vpop.permute.xlu1 %126  ;;  %v105_v53 = vpop.permute.xlu0 %104  ;;  %1862 = vmatprep.subr.bf16.mxu0 %v1978_v20 }
  0xac   :  { %v161_v56 = vsel %vm141_vm2, %v159_v54, %v127_v52  ;;  %v155_v57 = vsel %vm153_vm6, %v152_v55, %v105_v53 }
  0xae   :  { %1864 = vmatpush3.bf16.msra.mxu0 %v1863_v40 }
  0xaf   :  { %v133_v58 = vpop.permute.xlu1 %132  ;;  %v111_v59 = vpop.permute.xlu0 %110  ;;  %1745 = vmatprep.subr.mxu0 %v1553_v21 }
  0xb0   :  { %v163_v60 = vsel %vm144_vm3, %v161_v56, %v133_v58  ;;  %v158_v61 = vsel %vm156_vm7, %v155_v57, %v111_v59  ;;  %vm1520_vm7 = vcmask 392192  }
  0xb1   :  { %v177_v62 = vcombine.low %v163_v60, %v158_v61  ;;  %v170_v5 = vcombine.high %v158_v61, %v158_v61 }
  0xb3   :  { %v123_v63 = vpop.permute.xlu1 %122  ;;  %1665 = vmatmul.mubr.msk.f32.gmra.mrb[2].mxu0 %vm179_vm8, %v177_v62  ;;  %v117_v0 = vpop.permute.xlu0 %116 }
  0xb4   :  { %1667 = vmatprep.mubr.msk.f32.mxu0 %vm1968_vm0, %v1967_v11  ;;  %v160_v1 = vsel %vm138_vm1, %v117_v0, %v123_v63  ;;  %v485_v0 = vld [vmem:[%s2396_s3 + $0x30] sm:$0xff]  ;;  %vm884_vm1 = vcmp.eq.s32.totalorder %v2031_v3, 0 }
  0xb7   :  { %v129_v2 = vpop.permute.xlu0 %128  ;;  %v135_v4 = vpop.permute.xlu1 %134 }
  0xb8   :  { %v162_v7 = vsel %vm141_vm2, %v160_v1, %v129_v2  ;;  %v486_v1 = vld [vmem:[%s2396_s3 + $0x38] sm:$0xff]  ;;  %vm927_vm2 = vcmp.eq.s32.totalorder %v2031_v3, 1 }
  0xb9   :  { %v164_v8 = vsel %vm144_vm3, %v162_v7, %v135_v4  ;;  %v1875_v2 = vpack.c.bf16 %v486_v1, %v485_v0  ;;  %v2171_v4 = vsub.s32 2, %v2031_v3  ;;  %vm1376_vm3 = vcmask 1041409  }
  0xba   :  { %v178_v9 = vcombine.low %v170_v5, %v164_v8 }
  0xbb   :  { %v386_v5 = vrot.slane %v2117_v24, %v2171_v4 }
  0xbc   :  { %1668 = vmatmul.mubr.msk.f32.gmra.mrb[4].mxu0 %vm179_vm8, %v178_v9 }
  0xbd   :  { %1711 = vmatprep.mubr.msk.f32.mxu0 %vm1968_vm0, %v1967_v11 }
 0x174   :  { %v252_v26 = vpop.f32.mrb[0].mxu0 }
 0x175   :  { %v253_v27 = vadd.f32 %v252_v26, %v175_v25  ;;  %v1663_v28 = vpop.f32.mrb[1].mxu0  ;;  %v1979_v26 = vmov 1983009808  }
 0x177   :  { %v266_v29 = vmax.f32 %v253_v27, 0.0  ;;  %v587_v27 = vunpack.c.l.s4 %v1979_v26 }
 0x179   :  { %1687 = vmatmul.mubr.msk.f32.vlgmr.msra.gmra.mrb[0].mxu1 %vm281_vm9, %v266_v29 }
 0x17a   :  { %1689 = vmatprep.mubr.msk.f32.mxu1 %vm1968_vm0, %v1967_v11  ;;  %1867 = vmatpush3.bf16.msra.mxu1 %v1866_v44 }
 0x17b   :  { %1868 = vmatprep.subr.bf16.mxu1 %v1978_v20 }
 0x17e   :  { %1870 = vmatpush3.bf16.msra.mxu1 %v1869_v46 }
 0x17f   :  { %1871 = vmatprep.subr.bf16.mxu1 %v1978_v20 }
 0x182   :  { %1873 = vmatpush3.bf16.msra.mxu1 %v1872_v49 }
 0x183   :  { %1874 = vmatprep.subr.bf16.mxu1 %v1978_v20 }
 0x186   :  { %v257_v30 = vpop.f32.mrb[2].mxu0  ;;  %1876 = vmatpush3.bf16.msra.mxu1 %v1875_v2 }
 0x187   :  { %v258_v31 = vadd.f32 %v257_v30, %v175_v25  ;;  %v1666_v32 = vpop.f32.mrb[3].mxu0  ;;  %1877 = vmatprep.subr.bf16.mxu1 %v1978_v20 }
 0x188   :  { %v588_v32 = vunpack.c.0.s8 %v587_v27 }
 0x189   :  { %v267_v33 = vmax.f32 %v258_v31, 0.0 }
 0x18b   :  { %1690 = vmatmul.mubr.msk.f32.gmra.mrb[2].mxu1 %vm281_vm9, %v267_v33 }
 0x18c   :  { %1692 = vmatprep.mubr.msk.f32.mxu1 %vm1968_vm0, %v1967_v11 }
 0x18f   :  { %v262_v34 = vpop.f32.mrb[4].mxu0 }
 0x190   :  { %v263_v35 = vadd.f32 %v262_v34, %v175_v25  ;;  %v1669_v36 = vpop.f32.mrb[5].mxu0  ;;  %v490_v25 = vrot.slane %v2117_v24, %v2194_v23  ;;  %v2207_v34 = vsub.s32 %v588_v32, %v2031_v3 }
 0x192   :  { %v268_v37 = vmax.f32 %v263_v35, 0.0 }
 0x194   :  { %1693 = vmatmul.mubr.msk.f32.gmra.mrb[4].mxu1 %vm281_vm9, %v268_v37 }
 0x195   :  { %1736 = vmatprep.mubr.msk.f32.mxu1 %vm1968_vm0, %v1967_v11 }
 0x24c   :  { %v357_v52 = vpop.f32.mrb[0].mxu1 }
 0x24d   :  { %v358_v53 = vadd.f32 %v357_v52, %v280_v51  ;;  %v1688_v54 = vpop.f32.mrb[1].mxu1 }
 0x24f   :  { %v371_v55 = vmax.f32 %v358_v53, 0.0 }
 0x251   :  { %1712 = vmatmul.mubr.msk.f32.vlgmr.msra.gmra.mrb[6].mxu0 %vm281_vm9, %v371_v55 }
 0x252   :  { %1714 = vmatprep.mubr.msk.f32.mxu0 %vm1968_vm0, %v1967_v11  ;;  %1746 = vmatpush3.msra.mxu0 %v1553_v21 }
 0x253   :  { %1750 = vmatprep.subr.mxu0 %v2190_v22 }
 0x25e   :  { %v362_v56 = vpop.f32.mrb[2].mxu1 }
 0x25f   :  { %v363_v57 = vadd.f32 %v362_v56, %v280_v51  ;;  %v1691_v58 = vpop.f32.mrb[3].mxu1 }
 0x261   :  { %v372_v59 = vmax.f32 %v363_v57, 0.0 }
 0x263   :  { %1715 = vmatmul.mubr.msk.f32.gmra.mrb[8].mxu0 %vm281_vm9, %v372_v59 }
 0x264   :  { %1717 = vmatprep.mubr.msk.f32.mxu0 %vm1968_vm0, %v1967_v11 }
 0x267   :  { %v367_v60 = vpop.f32.mrb[4].mxu1 }
 0x268   :  { %v368_v61 = vadd.f32 %v367_v60, %v280_v51  ;;  %v1694_v62 = vpop.f32.mrb[5].mxu1 }
 0x26a   :  { %v373_v63 = vmax.f32 %v368_v61, 0.0 }
 0x26c   :  { %1718 = vmatmul.mubr.msk.f32.gmra.mrb[10].mxu0 %vm281_vm9, %v373_v63 }
 0x324   :  { %v462_v7 = vpop.f32.mrb[6].mxu0 }
 0x325   :  { %v463_v8 = vadd.f32 %v462_v7, %v386_v5  ;;  %v1713_v9 = vpop.f32.mrb[7].mxu0 }
 0x327   :  { %v476_v10 = vmax.f32 %v463_v8, 0.0 }
 0x329   :  { %1737 = vmatmul.mubr.msk.f32.vlgmr.msra.gmra.mrb[6].mxu1 %vm281_vm9, %v476_v10 }
 0x32a   :  { %1739 = vmatprep.mubr.msk.f32.mxu1 %vm1968_vm0, %v1967_v11 }
 0x336   :  { %v467_v12 = vpop.f32.mrb[8].mxu0 }
 0x337   :  { %v468_v13 = vadd.f32 %v467_v12, %v386_v5  ;;  %v1716_v14 = vpop.f32.mrb[9].mxu0 }
 0x339   :  { %v477_v15 = vmax.f32 %v468_v13, 0.0 }
 0x33b   :  { %1740 = vmatmul.mubr.msk.f32.gmra.mrb[8].mxu1 %vm281_vm9, %v477_v15 }
 0x33c   :  { %1742 = vmatprep.mubr.msk.f32.mxu1 %vm1968_vm0, %v1967_v11 }
 0x33f   :  { %v472_v16 = vpop.f32.mrb[10].mxu0 }
 0x340   :  { %v473_v17 = vadd.f32 %v472_v16, %v386_v5  ;;  %v1719_v18 = vpop.f32.mrb[11].mxu0 }
 0x342   :  { %v478_v19 = vmax.f32 %v473_v17, 0.0 }
 0x344   :  { %1743 = vmatmul.mubr.msk.f32.gmra.mrb[10].mxu1 %vm281_vm9, %v478_v19 }
 0x345   :  { %1782 = vmatprep.mubr.msk.f32.mxu1 %vm1968_vm0, %v1967_v11 }
 0x3fc   :  { %v566_v28 = vpop.f32.mrb[6].mxu1 }
 0x3fd   :  { %v2198_v29 = vadd.f32 %v566_v28, %v490_v25  ;;  %v1738_v30 = vpop.f32.mrb[7].mxu1 }
 0x3ff   :  { %v2202_v31 = vcombine.high %v2198_v29, %v2198_v29 }
 0x401   :  { %v936_v33 = vcombine.low %v2198_v29, %v2202_v31  ;;  %v592_v35 = vrot.slane %v2202_v31, %v2207_v34  ;;  %v1057_v31 = vld [vmem:[#allocation2 + $0xb0] sm:$0xff] }
 0x403   :  { %v593_v36 = vcombine.high %v592_v35, %v592_v35  ;;  %v1551_v43 = vrot.slane %v592_v35, 9 }
 0x405   :  { %v627_v38 = vrot.slane %v593_v36, 7  ;;  %v751_v58 = vcombine.low %v592_v35, %v593_v36 }
 0x407   :  { %v629_v44 = vrot.slane %v627_v38, 2  ;;  %v628_v47 = vsel %vm2213_vm15, %v1551_v43, %v627_v38  ;;  %v759_v8 = vrot.slane %v751_v58, %v2207_v34  ;;  %v1558_v43 = vld [vmem:[%s2394_s1 + $0x8] sm:$0xff] }
 0x40e   :  { %v571_v37 = vpop.f32.mrb[8].mxu1 }
 0x40f   :  { %v572_v39 = vadd.f32 %v571_v37, %v490_v25  ;;  %v1741_v40 = vpop.f32.mrb[9].mxu1 }
 0x411   :  { %v600_v41 = vrot.slane %v572_v39, %v2207_v34  ;;  %v584_v52 = vcombine.high %v572_v39, %v572_v39 }
 0x413   :  { %v630_v45 = vrot.slane %v600_v41, 7  ;;  %v617_v49 = vcombine.high %v600_v41, %v600_v41 }
 0x415   :  { %v631_v46 = vsel %vm2213_vm15, %v629_v44, %v630_v45  ;;  %v632_v59 = vrot.slane %v630_v45, 2  ;;  %v633_v60 = vrot.slane %v617_v49, 7 }
 0x416   :  { %v647_v48 = vcombine.low %v628_v47, %v631_v46 }
 0x417   :  { %v576_v51 = vpop.f32.mrb[10].mxu1  ;;  %v634_v7 = vsel %vm2213_vm15, %v632_v59, %v633_v60  ;;  %v1055_v59 = vld [vmem:[#allocation2 + $0xa0] sm:$0xff] }
 0x418   :  { %v577_v53 = vadd.f32 %v576_v51, %v490_v25  ;;  %v1744_v54 = vpop.f32.mrb[11].mxu1  ;;  %v655_v21 = vrot.slane %v647_v48, %v2207_v34 }
 0x419   :  { %v1053_v54 = vld [vmem:[#allocation2 + $0x90] sm:$0xff] }
 0x41a   :  { %v585_v55 = vcombine.high %v577_v53, %v577_v53  ;;  %v607_v56 = vrot.slane %v577_v53, %v2207_v34  ;;  %v2222_v57 = vcombine.low %v584_v52, %v577_v53  ;;  %v1051_v52 = vld [vmem:[#allocation2 + $0x80] sm:$0xff]  ;;  %v1052_v53 = vld [vmem:[#allocation2 + $0x88] sm:$0xff] }
 0x41c   :  { %v608_v61 = vcombine.high %v607_v56, %v607_v56  ;;  %v615_v62 = vrot.slane %v585_v55, %v2207_v34  ;;  %v752_v63 = vcombine.low %v600_v41, %v607_v56  ;;  %v1552_v1 = vrot.slane %v607_v56, 9  ;;  %v1054_v56 = vld [vmem:[#allocation2 + $0x98] sm:$0xff] }
 0x41d   :  { %v1878_v55 = vpack.c.bf16 %v1052_v53, %v1051_v52  ;;  %v1881_v58 = vpack.c.bf16 %v1054_v56, %v1053_v54  ;;  %v1569_v52 = vld [vmem:[%s2396_s3 + $0x48] sm:$0xff]  ;;  %v1570_v53 = vld [vmem:[%s2396_s3 + $0x50] sm:$0xff] }
 0x41e   :  { %v618_v0 = vcombine.high %v615_v62, %v615_v62  ;;  %v637_v2 = vrot.slane %v608_v61, 7  ;;  %v640_v5 = vrot.slane %v615_v62, 7  ;;  %v766_v9 = vrot.slane %v752_v63, %v2207_v34 }
 0x41f   :  { %v768_v28 = vcombine.low %v608_v61, %v615_v62  ;;  %1879 = vmatpush3.bf16.msra.mxu1 %v1878_v55  ;;  %v1571_v55 = vld [vmem:[%s2396_s3 + $0x58] sm:$0xff] }
 0x420   :  { %v639_v10 = vrot.slane %v637_v2, 2  ;;  %v642_v12 = vrot.slane %v640_v5, 2  ;;  %v643_v13 = vrot.slane %v618_v0, 7  ;;  %v638_v14 = vsel %vm2213_vm15, %v1552_v1, %v637_v2  ;;  %1880 = vmatprep.subr.bf16.mxu1 %v1978_v20 }
 0x421   :  { %v648_v15 = vcombine.low %v634_v7, %v638_v14  ;;  %v767_v16 = vcombine.low %v759_v8, %v766_v9  ;;  %v775_v30 = vrot.slane %v768_v28, %v2207_v34  ;;  %v1161_v28 = vld [vmem:[#allocation2 + $0xe8] sm:$0xff]  ;;  %v1905_v56 = vpack.c.bf16 %v1571_v55, %v1570_v53 }
 0x422   :  { %v641_v17 = vsel %vm2213_vm15, %v639_v10, %v640_v5  ;;  %v644_v18 = vsel %vm2213_vm15, %v642_v12, %v643_v13 }
 0x423   :  { %v664_v19 = vcombine.low %v641_v17, %v644_v18  ;;  %v662_v25 = vrot.slane %v648_v15, %v2207_v34  ;;  %1882 = vmatpush3.bf16.msra.mxu1 %v1881_v58  ;;  %v1156_v17 = vld [vmem:[#allocation2 + $0xc0] sm:$0xff]  ;;  %v1157_v18 = vld [vmem:[#allocation2 + $0xc8] sm:$0xff] }
 0x424   :  { %1883 = vmatprep.subr.bf16.mxu1 %v1978_v20  ;;  %v1572_v58 = vld [vmem:[%s2396_s3 + $0x60] sm:$0xff] }
 0x425   :  { %v663_v26 = vcombine.low %v655_v21, %v662_v25  ;;  %v671_v27 = vrot.slane %v664_v19, %v2207_v34  ;;  %v1158_v19 = vld [vmem:[#allocation2 + $0xd0] sm:$0xff]  ;;  %v1890_v21 = vpack.c.bf16 %v1157_v18, %v1156_v17  ;;  %v1159_v25 = vld [vmem:[#allocation2 + $0xd8] sm:$0xff] }
 0x427   :  { %1747 = vmatprep.mubr.msk.f32.mxu0 %vm179_vm8, %v663_v26  ;;  %v1893_v26 = vpack.c.bf16 %v1159_v25, %v1158_v19 }
 0x428   :  { %1748 = vmatmul.mubr.msk.f32.vlgmr.msra.gmra.mrb[12].mxu0 %vm179_vm8, %v671_v27  ;;  %v1160_v27 = vld [vmem:[#allocation2 + $0xe0] sm:$0xff] }
 0x429   :  { %1751 = vmatpush3.msra.mxu0 %v2190_v22  ;;  %1752 = vmatprep.mubr.msk.f32.mxu0 %vm179_vm8, %v767_v16 }
 0x42a   :  { %1755 = vmatprep.subr.mxu0 %v1967_v11 }
 0x430   :  { %1753 = vmatmul.mubr.msk.f32.vlgmr.msra.gmra.mrb[12].mxu0 %vm179_vm8, %v775_v30  ;;  %v1896_v30 = vpack.c.bf16 %v1161_v28, %v1160_v27 }
 0x431   :  { %1757 = vmatprep.mubr.msk.f32.mxu0 %vm1968_vm0, %v1967_v11  ;;  %1756 = vmatpush3.msra.mxu0 %v1558_v43 }
 0x432   :  { %1889 = vmatprep.subr.bf16.mxu0 %v1978_v20 }
 0x503   :  { %v1754_v32 = vpop.f32.mrb[12].mxu0 }
 0x504   :  { %v846_v35 = vpop.f32.mrb[13].mxu0  ;;  %v880_v36 = vrot.slane %v1754_v32, %v2207_v34  ;;  %v956_v32 = vsub.s32 4, %v2031_v3 }
 0x505   :  { %v857_v37 = vcombine.high %v846_v35, %v846_v35  ;;  %v864_v38 = vrot.slane %v846_v35, %v2207_v34 }
 0x506   :  { %v881_v40 = vcombine.high %v880_v36, %v880_v36  ;;  %v957_v35 = vrot.slane %v2117_v24, %v956_v32  ;;  %v1271_v32 = vsub.s32 7, %v2031_v3 }
 0x507   :  { %v871_v22 = vrot.slane %v857_v37, %v2207_v34  ;;  %v872_v39 = vcombine.high %v864_v38, %v864_v38 }
 0x508   :  { %v915_v47 = vrot.slane %v881_v40, %v2207_v34 }
 0x509   :  { %v873_v41 = vcombine.high %v871_v22, %v871_v22  ;;  %v885_v42 = vcombine.low %v864_v38, %v872_v39  ;;  %v899_v45 = vrot.slane %v871_v22, %v2207_v34 }
 0x50b   :  { %v892_v44 = vrot.slane %v885_v42, %v2207_v34  ;;  %v901_v46 = vcombine.low %v873_v41, %v880_v36 }
 0x50d   :  { %v900_v48 = vcombine.low %v892_v44, %v899_v45  ;;  %v908_v49 = vrot.slane %v901_v46, %v2207_v34  ;;  %v1056_v34 = vld [vmem:[#allocation2 + $0xa8] sm:$0xff] }
 0x50e   :  { %v1884_v60 = vpack.c.bf16 %v1056_v34, %v1055_v59  ;;  %v1573_v59 = vld [vmem:[%s2396_s3 + $0x68] sm:$0xff] }
 0x50f   :  { %928 = vrot.lane.b32.xlu1 %v900_v48, %s1966_s13  ;;  %919 = vrot.lane.b32.xlu0 %v900_v48, %s1970_s16  ;;  %v916_v51 = vcombine.low %v908_v49, %v915_v47  ;;  %v1162_v47 = vld [vmem:[#allocation2 + $0xf0] sm:$0xff]  ;;  %v1908_v34 = vpack.c.bf16 %v1573_v59, %v1572_v58 }
 0x510   :  { %1885 = vmatpush3.bf16.msra.mxu1 %v1884_v60  ;;  %v1061_v60 = vsub.s32 5, %v2031_v3 }
 0x511   :  { %1886 = vmatprep.subr.bf16.mxu1 %v1978_v20 }
 0x513   :  { %930 = vrot.lane.b32.xlu1 %v916_v51, %s1966_s13  ;;  %921 = vrot.lane.b32.xlu0 %v916_v51, %s1970_s16 }
 0x581   :  { %v929_v61 = vpop.permute.xlu1 %928  ;;  %v920_v62 = vpop.permute.xlu0 %919 }
 0x582   :  { %v925_v63 = vsel %vm884_vm1, %v900_v48, %v920_v62  ;;  %v1163_v48 = vld [vmem:[#allocation2 + $0xf8] sm:$0xff] }
 0x583   :  { %v934_v0 = vsel %vm927_vm2, %v929_v61, %v925_v63  ;;  %v1899_v49 = vpack.c.bf16 %v1163_v48, %v1162_v47  ;;  %v1062_v61 = vrot.slane %v2117_v24, %v1061_v60 }
 0x584   :  { %v942_v1 = vrot.slane %v934_v0, 2 }
 0x585   :  { %v931_v2 = vpop.permute.xlu1 %930  ;;  %v922_v5 = vpop.permute.xlu0 %921 }
 0x586   :  { %v946_v7 = vsel %vm153_vm6, %v936_v33, %v942_v1  ;;  %v926_v8 = vsel %vm884_vm1, %v916_v51, %v922_v5  ;;  %v1058_v33 = vld [vmem:[#allocation2 + $0xb8] sm:$0xff]  ;;  %v1568_v51 = vld [vmem:[%s2396_s3 + $0x40] sm:$0xff] }
 0x587   :  { %v950_v9 = vcombine.high %v946_v7, %v946_v7  ;;  %v935_v10 = vsel %vm927_vm2, %v931_v2, %v926_v8  ;;  %v1902_v54 = vpack.c.bf16 %v1569_v52, %v1568_v51 }
 0x588   :  { %v943_v12 = vrot.slane %v935_v10, 2 }
 0x589   :  { %v958_v13 = vcombine.low %v946_v7, %v950_v9 }
 0x58a   :  { %v947_v14 = vsel %vm153_vm6, %v2222_v57, %v943_v12  ;;  %v1887_v57 = vpack.c.bf16 %v1058_v33, %v1057_v31  ;;  %vm1518_vm6 = vcmask 326656  }
 0x58b   :  { %1758 = vmatmul.mubr.msk.f32.vlgmr.msra.gmra.mrb[14].mxu0 %vm179_vm8, %v958_v13  ;;  %v951_v15 = vcombine.high %v947_v14, %v947_v14  ;;  %v959_v16 = vcombine.low %v942_v1, %v947_v14  ;;  %v1574_v13 = vld [vmem:[%s2396_s3 + $0x70] sm:$0xff]  ;;  %v1575_v14 = vld [vmem:[%s2396_s3 + $0x78] sm:$0xff]  ;;  %s1980_s3 = smov 16  }
 0x58c   :  { %1760 = vmatprep.mubr.msk.f32.mxu0 %vm1968_vm0, %v1967_v11  ;;  %1888 = vmatpush3.bf16.msra.mxu1 %v1887_v57 }
 0x58d   :  { %v960_v29 = vcombine.low %v951_v15, %v943_v12  ;;  %1901 = vmatprep.subr.bf16.mxu1 %v1978_v20  ;;  %1891 = vmatpush3.bf16.msra.mxu0 %v1890_v21  ;;  %v1911_v15 = vpack.c.bf16 %v1575_v14, %v1574_v13 }
 0x58e   :  { %1892 = vmatprep.subr.bf16.mxu0 %v1978_v20 }
 0x58f   :  { %1761 = vmatmul.mubr.msk.f32.gmra.mrb[16].mxu0 %vm179_vm8, %v959_v16  ;;  %v1166_v16 = vsub.s32 6, %v2031_v3 }
 0x590   :  { %1763 = vmatprep.mubr.msk.f32.mxu0 %vm1968_vm0, %v1967_v11 }
 0x591   :  { %1894 = vmatpush3.bf16.msra.mxu0 %v1893_v26 }
 0x592   :  { %1895 = vmatprep.subr.bf16.mxu0 %v1978_v20 }
 0x593   :  { %1764 = vmatmul.mubr.msk.f32.gmra.mrb[18].mxu0 %vm179_vm8, %v960_v29  ;;  %v1167_v29 = vrot.slane %v2117_v24, %v1166_v16 }
 0x594   :  { %1807 = vmatprep.mubr.msk.f32.mxu0 %vm1968_vm0, %v1967_v11 }
 0x595   :  { %1897 = vmatpush3.bf16.msra.mxu0 %v1896_v30 }
 0x596   :  { %1898 = vmatprep.subr.bf16.mxu0 %v1978_v20 }
 0x599   :  { %1900 = vmatpush3.bf16.msra.mxu0 %v1899_v49 }
 0x65e   :  { %v1033_v36 = vpop.f32.mrb[14].mxu0 }
 0x65f   :  { %v1034_v37 = vadd.f32 %v1033_v36, %v957_v35  ;;  %v1759_v38 = vpop.f32.mrb[15].mxu0 }
 0x661   :  { %v1047_v22 = vmax.f32 %v1034_v37, 0.0 }
 0x662   :  { %v1038_v39 = vpop.f32.mrb[16].mxu0 }
 0x663   :  { %v1039_v40 = vadd.f32 %v1038_v39, %v957_v35  ;;  %v1762_v41 = vpop.f32.mrb[17].mxu0  ;;  %1783 = vmatmul.mubr.msk.f32.vlgmr.msra.gmra.mrb[12].mxu1 %vm281_vm9, %v1047_v22 }
 0x664   :  { %1785 = vmatprep.mubr.msk.f32.mxu1 %vm1968_vm0, %v1967_v11  ;;  %1903 = vmatpush3.bf16.msra.mxu1 %v1902_v54 }
 0x665   :  { %v1048_v42 = vmax.f32 %v1039_v40, 0.0  ;;  %1904 = vmatprep.subr.bf16.mxu1 %v1978_v20 }
 0x666   :  { %v1043_v43 = vpop.f32.mrb[18].mxu0 }
 0x667   :  { %v1044_v44 = vadd.f32 %v1043_v43, %v957_v35  ;;  %v1765_v45 = vpop.f32.mrb[19].mxu0  ;;  %1786 = vmatmul.mubr.msk.f32.gmra.mrb[14].mxu1 %vm281_vm9, %v1048_v42  ;;  %v1272_v35 = vrot.slane %v2117_v24, %v1271_v32 }
 0x668   :  { %1788 = vmatprep.mubr.msk.f32.mxu1 %vm1968_vm0, %v1967_v11  ;;  %1906 = vmatpush3.bf16.msra.mxu1 %v1905_v56 }
 0x669   :  { %v1049_v46 = vmax.f32 %v1044_v44, 0.0  ;;  %1907 = vmatprep.subr.bf16.mxu1 %v1978_v20 }
 0x66b   :  { %1789 = vmatmul.mubr.msk.f32.gmra.mrb[16].mxu1 %vm281_vm9, %v1049_v46 }
 0x66c   :  { %1832 = vmatprep.mubr.msk.f32.mxu1 %vm1968_vm0, %v1967_v11  ;;  %1909 = vmatpush3.bf16.msra.mxu1 %v1908_v34 }
 0x66d   :  { %1910 = vmatprep.subr.bf16.mxu1 %v1978_v20 }
 0x670   :  { %1912 = vmatpush3.bf16.msra.mxu1 %v1911_v15 }
 0x736   :  { %v1138_v62 = vpop.f32.mrb[12].mxu1 }
 0x737   :  { %v1139_v63 = vadd.f32 %v1138_v62, %v1062_v61  ;;  %v1784_v0 = vpop.f32.mrb[13].mxu1 }
 0x739   :  { %v1152_v1 = vmax.f32 %v1139_v63, 0.0 }
 0x73a   :  { %v1143_v2 = vpop.f32.mrb[14].mxu1 }
 0x73b   :  { %v1144_v5 = vadd.f32 %v1143_v2, %v1062_v61  ;;  %v1787_v7 = vpop.f32.mrb[15].mxu1  ;;  %1808 = vmatmul.mubr.msk.f32.vlgmr.msra.gmra.mrb[20].mxu0 %vm281_vm9, %v1152_v1 }
 0x73c   :  { %1810 = vmatprep.mubr.msk.f32.mxu0 %vm1968_vm0, %v1967_v11 }
 0x73d   :  { %v1153_v8 = vmax.f32 %v1144_v5, 0.0 }
 0x73e   :  { %v1148_v9 = vpop.f32.mrb[16].mxu1 }
 0x73f   :  { %v1149_v10 = vadd.f32 %v1148_v9, %v1062_v61  ;;  %v1790_v20 = vpop.f32.mrb[17].mxu1  ;;  %1811 = vmatmul.mubr.msk.f32.gmra.mrb[22].mxu0 %vm281_vm9, %v1153_v8 }
 0x740   :  { %1813 = vmatprep.mubr.msk.f32.mxu0 %vm1968_vm0, %v1967_v11 }
 0x741   :  { %v1154_v12 = vmax.f32 %v1149_v10, 0.0 }
 0x743   :  { %1814 = vmatmul.mubr.msk.f32.gmra.mrb[24].mxu0 %vm281_vm9, %v1154_v12 }
 0x80e   :  { %v1243_v31 = vpop.f32.mrb[20].mxu0 }
 0x80f   :  { %v1244_v33 = vadd.f32 %v1243_v31, %v1167_v29  ;;  %v1809_v57 = vpop.f32.mrb[21].mxu0 }
 0x811   :  { %v1257_v17 = vmax.f32 %v1244_v33, 0.0 }
 0x812   :  { %v1248_v18 = vpop.f32.mrb[22].mxu0 }
 0x813   :  { %v1249_v19 = vadd.f32 %v1248_v18, %v1167_v29  ;;  %v1812_v21 = vpop.f32.mrb[23].mxu0  ;;  %1833 = vmatmul.mubr.msk.f32.vlgmr.msra.gmra.mrb[18].mxu1 %vm281_vm9, %v1257_v17 }
 0x814   :  { %1835 = vmatprep.mubr.msk.f32.mxu1 %vm1968_vm0, %v1967_v11 }
 0x815   :  { %v1258_v25 = vmax.f32 %v1249_v19, 0.0 }
 0x816   :  { %v1253_v26 = vpop.f32.mrb[24].mxu0 }
 0x817   :  { %v1254_v27 = vadd.f32 %v1253_v26, %v1167_v29  ;;  %v1815_v28 = vpop.f32.mrb[25].mxu0  ;;  %1836 = vmatmul.mubr.msk.f32.gmra.mrb[20].mxu1 %vm281_vm9, %v1258_v25 }
 0x818   :  { %1838 = vmatprep.mubr.msk.f32.mxu1 %vm1968_vm0, %v1967_v11  ;;  %vm1512_vm0 = vcmask 130048  }
 0x819   :  { %v1259_v30 = vmax.f32 %v1254_v27, 0.0 }
 0x81b   :  { %1839 = vmatmul.mubr.msk.f32.gmra.mrb[22].mxu1 %vm281_vm9, %v1259_v30 }
 0x8e6   :  { %v1348_v36 = vpop.f32.mrb[18].mxu1 }
 0x8e7   :  { %v1349_v37 = vadd.f32 %v1348_v36, %v1272_v35  ;;  %v1834_v38 = vpop.f32.mrb[19].mxu1 }
 0x8e9   :  { %v1365_v22 = vcombine.high %v1349_v37, %v1349_v37  ;;  %v1394_v42 = vrot.slane %v1349_v37, %v2171_v4  ;;  %v1382_v43 = vrot.slane %v1349_v37, %v2152_v50  ;;  %v1406_v44 = vrot.slane %v1349_v37, %v2194_v23 }
 0x8ea   :  { %v1353_v39 = vpop.f32.mrb[20].mxu1  ;;  %v1371_v3 = vrot.slane %v1349_v37, %v2035_v6 }
 0x8eb   :  { %v1354_v40 = vadd.f32 %v1353_v39, %v1272_v35  ;;  %v1837_v41 = vpop.f32.mrb[21].mxu1  ;;  %v1418_v45 = vrot.slane %v1365_v22, %v2035_v6  ;;  %v1430_v46 = vrot.slane %v1365_v22, %v2152_v50  ;;  %v1442_v47 = vrot.slane %v1365_v22, %v2171_v4 }
 0x8ec   :  { %v1454_v48 = vrot.slane %v1365_v22, %v2194_v23 }
 0x8ed   :  { %v1366_v11 = vcombine.high %v1354_v40, %v1354_v40  ;;  %v1466_v49 = vrot.slane %v1354_v40, %v2035_v6  ;;  %v1478_v56 = vrot.slane %v1354_v40, %v2152_v50  ;;  %v1490_v58 = vrot.slane %v1354_v40, %v2171_v4 }
 0x8ee   :  { %v1358_v24 = vpop.f32.mrb[22].mxu1  ;;  %v1502_v59 = vrot.slane %v1354_v40, %v2194_v23 }
 0x8ef   :  { %v1359_v51 = vadd.f32 %v1358_v24, %v1272_v35  ;;  %v1840_v52 = vpop.f32.mrb[23].mxu1  ;;  %v1398_v53 = vrot.slane %v1366_v11, %v2171_v4  ;;  %v1386_v54 = vrot.slane %v1366_v11, %v2152_v50  ;;  %v1410_v55 = vrot.slane %v1366_v11, %v2194_v23 }
 0x8f0   :  { %v1375_v34 = vrot.slane %v1366_v11, %v2035_v6 }
 0x8f1   :  { %v1367_v60 = vcombine.high %v1359_v51, %v1359_v51  ;;  %v1399_v61 = vsel %vm1376_vm3, %v1398_v53, %v1394_v42  ;;  %v1387_v62 = vsel %vm1376_vm3, %v1386_v54, %v1382_v43  ;;  %v1411_v63 = vsel %vm1376_vm3, %v1410_v55, %v1406_v44 }
 0x8f2   :  { %1400 = vrot.lane.b32.xlu1 %v1399_v61, %s1980_s3  ;;  %1388 = vrot.lane.b32.xlu0 %v1387_v62, %s1963_s8  ;;  %v1422_v0 = vrot.slane %v1359_v51, %v2035_v6  ;;  %v1434_v1 = vrot.slane %v1359_v51, %v2152_v50  ;;  %v1446_v2 = vrot.slane %v1359_v51, %v2171_v4  ;;  %s1981_s8 = smov 24  }
 0x8f3   :  { %v1458_v5 = vrot.slane %v1359_v51, %v2194_v23  ;;  %v1470_v7 = vrot.slane %v1367_v60, %v2035_v6  ;;  %v1482_v8 = vrot.slane %v1367_v60, %v2152_v50  ;;  %v1494_v9 = vrot.slane %v1367_v60, %v2171_v4 }
 0x8f4   :  { %v1423_v10 = vsel %vm1376_vm3, %v1422_v0, %v1418_v45  ;;  %v1435_v20 = vsel %vm1376_vm3, %v1434_v1, %v1430_v46  ;;  %v1447_v12 = vsel %vm1376_vm3, %v1446_v2, %v1442_v47  ;;  %v1506_v13 = vrot.slane %v1367_v60, %v2194_v23 }
 0x8f5   :  { %v1459_v14 = vsel %vm1376_vm3, %v1458_v5, %v1454_v48  ;;  %v1471_v15 = vsel %vm1376_vm3, %v1470_v7, %v1466_v49  ;;  %v1483_v16 = vsel %vm1376_vm3, %v1482_v8, %v1478_v56  ;;  %v1495_v6 = vsel %vm1376_vm3, %v1494_v9, %v1490_v58 }
 0x8f6   :  { %1412 = vrot.lane.b32.xlu0 %v1411_v63, %s1981_s8  ;;  %1424 = vrot.lane.b32.xlu1 %v1423_v10, %s1982_s4  ;;  %v1507_v50 = vsel %vm1376_vm3, %v1506_v13, %v1502_v59  ;;  %v1377_v4 = vsel %vm1376_vm3, %v1375_v34, %v1371_v3 }
 0x8fa   :  { %1436 = vrot.lane.b32.xlu0 %v1435_v20, %s1977_s23  ;;  %1448 = vrot.lane.b32.xlu1 %v1447_v12, %s1976_s22 }
 0x8fe   :  { %1460 = vrot.lane.b32.xlu0 %v1459_v14, %s1974_s20  ;;  %1472 = vrot.lane.b32.xlu1 %v1471_v15, %s1975_s21 }
 0x902   :  { %1484 = vrot.lane.b32.xlu0 %v1483_v16, %s1973_s19  ;;  %1496 = vrot.lane.b32.xlu1 %v1495_v6, %s1971_s17 }
 0x906   :  { %1508 = vrot.lane.b32.xlu0 %v1507_v50, %s1972_s18 }
 0x964   :  { %v1401_v23 = vpop.permute.xlu1 %1400  ;;  %v1389_v29 = vpop.permute.xlu0 %1388 }
 0x965   :  { %v1511_v31 = vsel %vm179_vm8, %v1377_v4, %v1389_v29  ;;  %vm1527_vm8 = vcmask 654336  }
 0x966   :  { %v1513_v57 = vsel %vm1512_vm0, %v1511_v31, %v1401_v23 }
 0x968   :  { %v1413_v33 = vpop.permute.xlu0 %1412  ;;  %v1425_v17 = vpop.permute.xlu1 %1424 }
 0x969   :  { %v1515_v18 = vsel %vm1514_vm4, %v1513_v57, %v1413_v33 }
 0x96a   :  { %v1517_v19 = vsel %vm1516_vm5, %v1515_v18, %v1425_v17 }
 0x96c   :  { %v1437_v21 = vpop.permute.xlu0 %1436  ;;  %v1449_v25 = vpop.permute.xlu1 %1448 }
 0x96d   :  { %v1519_v26 = vsel %vm1518_vm6, %v1517_v19, %v1437_v21 }
 0x96e   :  { %v1521_v27 = vsel %vm1520_vm7, %v1519_v26, %v1449_v25 }
 0x970   :  { %v1461_v28 = vpop.permute.xlu0 %1460  ;;  %v1473_v30 = vpop.permute.xlu1 %1472 }
 0x971   :  { %v1523_v32 = vsel %vm1522_vm10, %v1521_v27, %v1461_v28 }
 0x972   :  { %v1524_v35 = vsel %vm281_vm9, %v1523_v32, %v1473_v30 }
 0x974   :  { %v1485_v36 = vpop.permute.xlu0 %1484  ;;  %v1497_v38 = vpop.permute.xlu1 %1496 }
 0x975   :  { %v1526_v37 = vsel %vm1525_vm11, %v1524_v35, %v1485_v36 }
 0x976   :  { %v1528_v22 = vsel %vm1527_vm8, %v1526_v37, %v1497_v38 }
 0x978   :  { %v1509_v39 = vpop.permute.xlu0 %1508 }
 0x979   :  { %v1530_v40 = vsel %vm1529_vm12, %v1528_v22, %v1509_v39 }
 0x97a   :  { %1532 = vst.msk [vmem:[%s2399_s6] sm:$0x3] %vm1531_vm13, %v1530_v40 }
 0x97b   :  { %1537 = vsyncpa [#allocation3], 1 }

</bundles_post_ra>
